<compile_context>
chip_gen: v5e
topology: v5e:2x2
jax: 0.10.0
libtpu: 0.0.40
codegen_flags: <defaults>
</compile_context>

<pallas_src>
import jax
import jax.numpy as jnp
from jax.experimental import pallas as pl
from jax.experimental.pallas import tpu as pltpu


_SMALL_MAX = 16384                   # <= this many elements -> one full-extent block
_MIN_GRID = 8                        # aim for at least this many grid steps when tiled
_LANE_TILES = (1024, 512, 256, 128)  # candidate lane-dense slab widths


def _round_up(x: int, m: int) -> int:
    return (x + m - 1) // m * m


def _device_tiling_defaults():
    """(tile_elems, vmem_limit_bytes) sized to the current TPU generation."""
    try:
        vmem = pltpu.get_tpu_info().vmem_capacity_bytes
    except Exception:          # be conservative if the query is unavailable
        vmem = 64 << 20
    if vmem <= (64 << 20):     # v7x-class: 64 MiB VMEM per TensorCore
        return 512 * 1024, 32 << 20      # ~2 MiB f32 per tile, 32 MiB scoped limit
    return 1024 * 1024, 48 << 20         # v5e / v6e (128 MiB VMEM): ~4 MiB tiles


def _make_kernel(rows: int, tm: int, mask_rows: bool):
    """Per-block partial sum of (log(p+1) - log(a+1))**2 -> SMEM scalar."""
    def kernel(pred_ref, actual_ref, out_ref):
        p = pred_ref[...].astype(jnp.float32)
        a = actual_ref[...].astype(jnp.float32)
        # Matches torch.log(x + 1) exactly (log1p would change semantics).
        d = jnp.log(p + 1.0) - jnp.log(a + 1.0)
        sq = d * d
        if mask_rows:
            # Edge block: rows past the array hold stale VMEM data.  Use a
            # select (jnp.where) so garbage/NaN cannot leak into the sum.
            i = pl.program_id(0)
            r = jax.lax.broadcasted_iota(jnp.int32, sq.shape, 0)
            sq = jnp.where(r < rows - i * tm, sq, 0.0)
        out_ref[0, 0] = jnp.sum(sq)
    return kernel


def _tail_sumsq(p, a):
    p = p.astype(jnp.float32)
    a = a.astype(jnp.float32)
    d = jnp.log(p + 1.0) - jnp.log(a + 1.0)
    return jnp.sum(d * d)


def rmsle_loss(pred, actual, *, small_max=_SMALL_MAX, tile_elems=None,
               vmem_limit_bytes=None, min_grid=_MIN_GRID, input_buffers=3):
    assert pred.shape == actual.shape, "pred/actual must match (MSELoss semantics)"
    total = pred.size
    itemsize = jnp.dtype(pred.dtype).itemsize
    sub = 16 if itemsize == 2 else 8        # sublane multiple (bf16 packs x2)

    dev_tile, dev_limit = _device_tiling_defaults()
    tile_elems = dev_tile if tile_elems is None else tile_elems
    vmem_limit_bytes = dev_limit if vmem_limit_bytes is None else vmem_limit_bytes

    p_flat = pred.reshape(-1)               # row-major reshape: free, no copy
    a_flat = actual.reshape(-1)

    # ---- choose a lane-dense, copy-free layout -------------------------------
    rem = 0
    cols = None
    if total > small_max:
        rem = total % 128
        main = total - rem
        for c in _LANE_TILES:
            if main % c == 0 and main // c >= sub:
                cols = c
                break

    if cols is None:
        # Small input: single full-extent block (always a legal block shape).
        rows, cols, tm, gm, rem = 1, total, 1, 1, 0
        mask_rows = False
        p_main, a_main = p_flat.reshape(1, total), a_flat.reshape(1, total)
    else:
        rows = main // cols
        tm_cap = max(sub, (tile_elems // cols) // sub * sub)          # VMEM budget
        tm_bal = max(sub, _round_up(pl.cdiv(rows, min_grid), sub))    # >= min_grid steps
        tm = min(tm_cap, tm_bal, _round_up(rows, sub))
        gm = pl.cdiv(rows, tm)
        mask_rows = (rows % tm) != 0
        if rem == 0:
            # Zero-copy: exact (rows, cols) view of the flat input.
            p_main = p_flat.reshape(rows, cols)
            a_main = a_flat.reshape(rows, cols)
        else:
            # total not 128-aligned: kernel on the largest 128-aligned prefix;
            # the <128-element tail is reduced in the wrapper below.
            p_main = p_flat[:main].reshape(rows, cols)
            a_main = a_flat[:main].reshape(rows, cols)

    # ---- pallas call ---------------------------------------------------------
    spec_kwargs = {}
    if gm >= 3 and input_buffers > 2:
        # Small tiles + near-zero compute: deeper input buffering keeps the
        # DMA queue full so we stay on the HBM roofline.
        spec_kwargs = dict(pipeline_mode=pl.Buffered(input_buffers))
    in_spec = pl.BlockSpec((tm, cols), lambda i: (i, 0), **spec_kwargs)

    kernel_elems = rows * cols
    partials = pl.pallas_call(
        _make_kernel(rows, tm, mask_rows),
        out_shape=jax.ShapeDtypeStruct((gm, 1), jnp.float32),
        grid=(gm,),
        in_specs=[in_spec, in_spec],
        out_specs=pl.BlockSpec((1, 1), lambda i: (i, 0),
                               memory_space=pltpu.MemorySpace.SMEM),
        compiler_params=pltpu.CompilerParams(
            # Per-block partial sums are independent -> both TensorCores on v7x.
            dimension_semantics=("parallel",),
            vmem_limit_bytes=vmem_limit_bytes,
        ),
        cost_estimate=pl.CostEstimate(
            flops=5 * kernel_elems,
            transcendentals=2 * kernel_elems,
            bytes_accessed=2 * kernel_elems * itemsize + 4 * gm,
        ),
    )(p_main, a_main)

    ssq = jnp.sum(partials)
    if rem:
        ssq = ssq + _tail_sumsq(p_flat[total - rem:], a_flat[total - rem:])
    # Mean over the TRUE element count, then sqrt (few-element finalize).
    return jnp.sqrt(ssq / jnp.float32(total))


def rmsle_ref(pred, actual):
    p = pred.astype(jnp.float32)
    a = actual.astype(jnp.float32)
    d = jnp.log(p + 1.0) - jnp.log(a + 1.0)
    return jnp.sqrt(jnp.mean(d * d))


if __name__ == "__main__":
    key = jax.random.PRNGKey(0)

    def make(shape, dtype, k):
        k1, k2 = jax.random.split(k)
        # Positive inputs (house prices are positive; log needs x + 1 > 0).
        pred = jnp.exp(jax.random.normal(k1, shape, dtype=jnp.float32)) * 10.0
        actual = jnp.exp(jax.random.normal(k2, shape, dtype=jnp.float32)) * 10.0
        return pred.astype(dtype), actual.astype(dtype)

    cases = []
    k = key
    # (a) tiny "house prices" style target column -> single-block small path.
    k, sk = jax.random.split(k)
    cases.append(("small_column", make((64, 1), jnp.float32, sk)))
    # (b) 128-aligned input -> zero-copy tiled path, multi-step parallel grid.
    k, sk = jax.random.split(k)
    cases.append(("tiled_zero_copy", make((96, 256), jnp.float32, sk)))
    # (c) non-aligned input -> edge-row masking in-kernel + wrapper tail sum.
    k, sk = jax.random.split(k)
    cases.append(("tiled_mask_tail", make((129, 130), jnp.float32, sk)))
    # (d) bf16 inputs (halved HBM traffic; kernel upcasts to f32 internally).
    k, sk = jax.random.split(k)
    cases.append(("bf16", make((64, 512), jnp.bfloat16, sk)))

    for name, (pred, actual) in cases:
        loss = jax.block_until_ready(rmsle_loss(pred, actual))
        ref = rmsle_ref(pred, actual)
        assert jnp.allclose(loss, ref, rtol=1e-4, atol=1e-5), (name, float(loss), float(ref))

    print("KERNEL_OK")
</pallas_src>

<mosaic_0001>
module attributes {stable_mosaic.version = 11 : i64} {
  func.func @kernel(%arg0: i32, %arg1: memref<1x64xf32, #tpu.memory_space<vmem>>, %arg2: memref<1x64xf32, #tpu.memory_space<vmem>>, %arg3: memref<1x1xf32, #tpu.memory_space<smem>>) attributes {dimension_semantics = [#tpu.dimension_semantics<parallel>], iteration_bounds = array<i64: 1>, scalar_prefetch = 0 : i64, scratch_operands = 0 : i64, tpu.core_type = #tpu.core_type<tc>, window_params = [{transform_indices = @transform_0, window_bounds = array<i64: 1, 64>}, {transform_indices = @transform_1, window_bounds = array<i64: 1, 64>}, {transform_indices = @transform_2, window_bounds = array<i64: 1, 1>}]} {
    %c0 = arith.constant 0 : index
    %c0_0 = arith.constant 0 : index
    %0 = vector.load %arg1[%c0, %c0_0] : memref<1x64xf32, #tpu.memory_space<vmem>>, vector<1x64xf32>
    %c0_1 = arith.constant 0 : index
    %c0_2 = arith.constant 0 : index
    %1 = vector.load %arg2[%c0_1, %c0_2] : memref<1x64xf32, #tpu.memory_space<vmem>>, vector<1x64xf32>
    %cst = arith.constant 1.000000e+00 : f32
    %2 = vector.broadcast %cst : f32 to vector<1x64xf32>
    %3 = arith.addf %0, %2 : vector<1x64xf32>
    %4 = math.log %3 : vector<1x64xf32>
    %cst_3 = arith.constant 1.000000e+00 : f32
    %5 = vector.broadcast %cst_3 : f32 to vector<1x64xf32>
    %6 = arith.addf %1, %5 : vector<1x64xf32>
    %7 = math.log %6 : vector<1x64xf32>
    %8 = arith.subf %4, %7 : vector<1x64xf32>
    %9 = arith.mulf %8, %8 : vector<1x64xf32>
    %10 = vector.shape_cast %9 : vector<1x64xf32> to vector<1x1x64xf32>
    %cst_4 = arith.constant dense<0.000000e+00> : vector<1xf32>
    %11 = vector.multi_reduction <add>, %10, %cst_4 [1, 2] : vector<1x1x64xf32> to vector<1xf32>
    %12 = vector.shape_cast %11 : vector<1xf32> to vector<1x1x1xf32>
    %13 = vector.extract %12[0, 0, 0] : f32 from vector<1x1x1xf32>
    %c0_5 = arith.constant 0 : index
    %c0_6 = arith.constant 0 : index
    %14 = memref.load %arg3[%c0_5, %c0_6] : memref<1x1xf32, #tpu.memory_space<smem>>
    memref.store %13, %arg3[%c0_5, %c0_6] : memref<1x1xf32, #tpu.memory_space<smem>>
    return
  }
  func.func @transform_0(%arg0: i32) -> (i32, i32) {
    %c0_i32 = arith.constant 0 : i32
    %c0_i32_0 = arith.constant 0 : i32
    return %arg0, %c0_i32 : i32, i32
  }
  func.func @transform_1(%arg0: i32) -> (i32, i32) {
    %c0_i32 = arith.constant 0 : i32
    %c0_i32_0 = arith.constant 0 : i32
    return %arg0, %c0_i32 : i32, i32
  }
  func.func @transform_2(%arg0: i32) -> (i32, i32) {
    %c0_i32 = arith.constant 0 : i32
    %c0_i32_0 = arith.constant 0 : i32
    return %arg0, %c0_i32 : i32, i32
  }
}

</mosaic_0001>

<bundles_post_ra>
// kernel: tpu_custom_call.1
= control target key start
LH: loop header
LB: loop body
LE: loop exit
PB: predicated region body
PF: predicated region fallthrough
CT: control target
= control target key end

     0   :  { %7 = vsyncpa [#allocation3], 0  ;;  %s182_s0 = inlined_call_operand.hbm [shape: f32[1,64], index: 0, kind: input, shape index: {}]   ;;  %s183_s1 = inlined_call_operand.hbm [shape: f32[1,64], index: 1, kind: input, shape index: {}]   ;;  %s184_s2 = inlined_call_operand.hbm [shape: f32[1,1], index: 2, kind: output, shape index: {}]  }
   0x1   :  { %8 = vsyncpa [#allocation6], 0 }
   0x2   :  { %9 = vsyncpa [#allocation4], 0  ;;  %s15_s11 = sshll.u32 %s182_s0, 4  ;;  %s155_s12 = smov [#allocation2]   ;;  %s16_s11 = int_to_ptr.hbm [resolvable:$true] %s15_s11 }
   0x3   :  { %s17_s13 = sshll.u32 %s155_s12, 4  ;;  %s26_s16 = sshll.u32 %s183_s1, 4  ;;  %s18_s13 = int_to_ptr.vmem [resolvable:$true] %s17_s13  ;;  %s27_s16 = int_to_ptr.hbm [resolvable:$true] %s26_s16 }
   0x4   :  { %20 = dma.hbm_to_vmem [thread:$0]  %s16_s11, 16, %s18_s13, [#allocation3]  }
   0x5   :  { %s156_s17 = smov [#allocation5]  }
   0x6   :  { %s28_s18 = sshll.u32 %s156_s17, 4  ;;  %s29_s18 = int_to_ptr.vmem [resolvable:$true] %s28_s18 }
   0x7   :  { %31 = dma.hbm_to_vmem [thread:$0]  %s27_s16, 16, %s29_s18, [#allocation6]  }
   0x8   :  { %149 = dma.done.wait [#allocation3], 16  }
   0x9   :  { %150 = vsyncadd [#allocation3], 4294967280 }
   0xa   :  { %151 = dma.done.wait [#allocation6], 16  }
   0xb   :  { %152 = vsyncadd [#allocation6], 4294967280  ;;  %v40_v0 = vld [vmem:[#allocation2] sm:$0x1]  ;;  %v41_v1 = vld [vmem:[#allocation5] sm:$0x1] }
   0xc   :  { %v42_v2 = vadd.f32 1.0, %v40_v0  ;;  %v45_v3 = vadd.f32 1.0, %v41_v1  ;;  %vm50_vm0 = vcmask 516096   ;;  %s68_s19 = sshll.u32 %s184_s2, 4  ;;  %s157_s21 = smov [#allocation7]   ;;  %s69_s19 = int_to_ptr.hbm [resolvable:$true] %s68_s19 }
   0xe   :  { %85 = vlog2.f32 %v42_v2 }
   0xf   :  { %87 = vlog2.f32 %v45_v3 }
  0x14   :  { %v86_v4 = vpop.eup %85 }
  0x15   :  { %v88_v5 = vpop.eup %87  ;;  %v44_v6 = vmul.f32 0.6931472, %v86_v4 }
  0x16   :  { %v47_v7 = vmul.f32 0.6931472, %v88_v5 }
  0x18   :  { %v48_v8 = vsub.f32 %v44_v6, %v47_v7 }
  0x1a   :  { %v49_v9 = vmul.f32 %v48_v8, %v48_v8 }
  0x1c   :  { %v51_v10 = vsel %vm50_vm0, %v49_v9, 0.0 }
  0x1d   :  { %52 = vadd.xlane.f32.xlu0 %v51_v10 }
  0x90   :  { %v53_v11 = vpop.xlane.xlu0 %52 }
  0x91   :  { %v54_v12 = vrot.slane %v53_v11, 4 }
  0x93   :  { %v55_v13 = vadd.f32 %v54_v12, %v53_v11 }
  0x95   :  { %v56_v14 = vrot.slane %v55_v13, 2 }
  0x97   :  { %v57_v15 = vadd.f32 %v56_v14, %v55_v13 }
  0x99   :  { %v58_v16 = vrot.slane %v57_v15, 1 }
  0x9b   :  { %v59_v17 = vadd.f32 %v58_v16, %v57_v15 }
  0x9d   :  { %80 = vpush %v59_v17 }
  0xce   :  { %s81_s20 = spop %80 }
  0xcf   :  { %62 = sst [smem:[#allocation7]] %s81_s20 }
  0xd0   :  { %71 = dma.smem_to_hbm %s157_s21, 16, %s69_s19, [#allocation4]  }
  0xd1   :  { %153 = dma.done.wait [#allocation4], 16  }
  0xd2   :  { %154 = vsyncadd [#allocation4], 4294967280 }
  0xd3   :  { %76 = sfence }
  0xd4   :  { %77 = vsyncpa [#allocation3], 1 }
  0xd5   :  { %78 = vsyncpa [#allocation6], 1 }
  0xd6   :  { %79 = vsyncpa [#allocation4], 1 }

</bundles_post_ra>
